<compile_context>
chip_gen: v7x
topology: tpu7x:2x2x1
jax: 0.10.0
libtpu: 0.0.40
codegen_flags: <defaults>
</compile_context>

<pallas_src>
import jax
import jax.numpy as jnp
from jax.experimental import pallas as pl
from jax.experimental.pallas import tpu as pltpu

_LANES = 128
_SUBLANES = 8
_MAX_CHUNK_ROWS = 1024   # in-kernel compute chunk: f32 temps <= ~512 KiB each


def _cdiv(a, b):
    return (a + b - 1) // b


def _round_up(a, b):
    return _cdiv(a, b) * b


def _chip_config():
    """Static (trace-time) per-generation tuning.

    Returns (core_splits, bytes_per_input_per_buffer, vmem_limit_bytes).
      * v7x: 2 TensorCores/chip -> always split the outer grid axis 2-way;
        8 MiB blocks (32 MiB double-buffered across 2 inputs) need an explicit
        VMEM limit (default scoped limit is 32 MiB of 64 MiB physical per TC).
      * v5e: default scoped VMEM is only 16 MiB -> cap at 2 MiB/input/buffer
        (8 MiB of buffers), already ~94% of its ~0.82 TB/s roofline, no flag.
      * v6e / unknown: 4 MiB/input/buffer fits the 32 MiB default with room
        for elementwise temporaries.
    """
    try:
        kind = jax.devices()[0].device_kind.lower()
    except Exception:
        kind = ""
    if "v7" in kind or "7x" in kind:
        return 2, 8 << 20, 48 << 20
    if "v5e" in kind or "v5 lite" in kind or "v5lite" in kind:
        return 1, 2 << 20, None
    return 1, 4 << 20, None


def _plan(rows, itemsize, core_splits, budget_bytes):
    """Static tiling plan for a (rows, 128) slab (rows a positive multiple of 8).

    Returns (block_rows, chunk_rows, n_inner, n_blocks_real, n_full_blocks,
    need_mask).  grid = (core_splits, n_inner); logical block id = c*n_inner+i,
    clamped to n_blocks_real-1 for DMA; blocks with id >= n_full_blocks take
    the masked path (partial tail block and duplicated blocks).
    """
    budget_rows = max(
        _SUBLANES,
        (budget_bytes // (_LANES * itemsize)) // _SUBLANES * _SUBLANES)
    per_core_rows = _round_up(_cdiv(rows, core_splits), _SUBLANES)
    block_rows = min(budget_rows, per_core_rows)
    chunk_rows = min(_MAX_CHUNK_ROWS, block_rows)
    block_rows = (block_rows // chunk_rows) * chunk_rows   # multiple of chunk
    n_blocks_real = _cdiv(rows, block_rows)
    n_inner = _cdiv(n_blocks_real, core_splits)
    n_full_blocks = rows // block_rows
    need_mask = (core_splits * n_inner * block_rows != rows)
    return block_rows, chunk_rows, n_inner, n_blocks_real, n_full_blocks, need_mask


def _make_kernel(rows, block_rows, chunk_rows, n_inner, n_full_blocks,
                 need_mask):
    n_chunks = block_rows // chunk_rows
    k8 = chunk_rows // _SUBLANES

    def kernel(p_ref, t_ref, abs_ref, sq_ref, gt_ref):
        c = pl.program_id(0)
        i = pl.program_id(1)

        @pl.when(i == 0)
        def _():
            abs_ref[...] = jnp.zeros_like(abs_ref)
            sq_ref[...] = jnp.zeros_like(sq_ref)
            gt_ref[...] = jnp.zeros_like(gt_ref)

        def accumulate(p, t):
            # (chunk_rows,128) -> (k8,8,128): layout-preserving sublane split;
            # summing axis 0 is plain vadds (no XLU cross-sublane reduce).
            d = p - t
            abs_ref[...] += jnp.sum(
                jnp.abs(d).reshape(k8, _SUBLANES, _LANES), axis=0)[None]
            sq_ref[...] += jnp.sum(
                (d * d).reshape(k8, _SUBLANES, _LANES), axis=0)[None]
            gt_ref[...] += jnp.sum(
                (p > t).astype(jnp.int32).reshape(k8, _SUBLANES, _LANES),
                axis=0)[None]

        def load_chunk(s):
            r0 = pl.multiple_of(s * chunk_rows, chunk_rows)
            p = p_ref[pl.ds(r0, chunk_rows), :].astype(jnp.float32)
            t = t_ref[pl.ds(r0, chunk_rows), :].astype(jnp.float32)
            return p, t

        if not need_mask:
            @pl.loop(0, n_chunks)
            def _(s):
                p, t = load_chunk(s)
                accumulate(p, t)
            return

        blk = c * n_inner + i   # logical (unclamped) block id

        @pl.when(blk < n_full_blocks)        # fast path: fully-valid block
        def _():
            @pl.loop(0, n_chunks)
            def _(s):
                p, t = load_chunk(s)
                accumulate(p, t)

        @pl.when(blk >= n_full_blocks)       # slow path: tail / duplicated blk
        def _():
            @pl.loop(0, n_chunks)
            def _(s):
                p, t = load_chunk(s)
                row_ids = jax.lax.broadcasted_iota(
                    jnp.int32, (chunk_rows, _LANES), 0)
                # Rows past the slab end (including fully-duplicated blocks on
                # the v7x 2-way split) are zeroed so even NaN garbage in the
                # unspecified OOB region cannot leak into the sums/count.
                valid = blk * block_rows + s * chunk_rows + row_ids < rows
                accumulate(jnp.where(valid, p, 0.0), jnp.where(valid, t, 0.0))

    return kernel


def _partial_sums(p2, t2, core_splits, n_inner, block_rows, chunk_rows,
                  n_blocks_real, n_full_blocks, need_mask, vmem_limit):
    rows = p2.shape[0]
    kernel = _make_kernel(rows, block_rows, chunk_rows, n_inner,
                          n_full_blocks, need_mask)

    last_blk = n_blocks_real - 1

    def in_map(c, i):
        # Clamp so duplicated grid points (v7x split with an odd block count)
        # never start a DMA window fully out of bounds; their contribution is
        # masked to zero inside the kernel.
        return (jnp.minimum(c * n_inner + i, last_blk), 0)

    in_blk = pl.BlockSpec((block_rows, _LANES), in_map)
    out_blk = pl.BlockSpec((1, _SUBLANES, _LANES), lambda c, i: (c, 0, 0))
    f32_out = jax.ShapeDtypeStruct((core_splits, _SUBLANES, _LANES),
                                   jnp.float32)
    i32_out = jax.ShapeDtypeStruct((core_splits, _SUBLANES, _LANES),
                                   jnp.int32)

    params = dict(dimension_semantics=("parallel", "arbitrary"))
    if vmem_limit is not None:
        params["vmem_limit_bytes"] = vmem_limit

    return pl.pallas_call(
        kernel,
        out_shape=(f32_out, f32_out, i32_out),
        grid_spec=pltpu.PrefetchScalarGridSpec(
            num_scalar_prefetch=0,
            grid=(core_splits, n_inner),
            in_specs=[in_blk, in_blk],
            out_specs=[out_blk, out_blk, out_blk],
        ),
        compiler_params=pltpu.CompilerParams(**params),
    )(p2, t2)


def asymmetric_mae_mse_loss(predictions, targets):
    """Pallas implementation of AsymmetricMAEandMSELoss.forward."""
    assert predictions.shape == targets.shape
    n = predictions.size  # static
    if n == 0:
        return jnp.float32(jnp.nan)  # torch.mean of empty tensor -> nan

    core_splits, budget_bytes, vmem_limit = _chip_config()

    # Keep native dtype; the kernel casts to f32 internally.
    p = predictions.reshape(-1)
    t = targets.reshape(-1)

    # Pad only when the element count is not already (8*128)-aligned (needed
    # for the lane-dense 2-D reshape); the block-grain remainder is handled
    # by the in-kernel row mask, so aligned inputs take zero extra copies.
    padded_n = _round_up(n, _SUBLANES * _LANES)
    if padded_n != n:
        # zero padding contributes 0 to |d|, d^2 and the (p > t) count
        p = jnp.pad(p, (0, padded_n - n))
        t = jnp.pad(t, (0, padded_n - n))

    rows = padded_n // _LANES
    p2 = p.reshape(rows, _LANES)
    t2 = t.reshape(rows, _LANES)

    itemsize = jnp.dtype(predictions.dtype).itemsize
    (block_rows, chunk_rows, n_inner, n_blocks_real,
     n_full_blocks, need_mask) = _plan(rows, itemsize, core_splits,
                                       budget_bytes)

    abs_p, sq_p, gt_p = _partial_sums(
        p2, t2, core_splits, n_inner, block_rows, chunk_rows,
        n_blocks_real, n_full_blocks, need_mask, vmem_limit)

    # NOTE: per-lane sequential f32 accumulation differs in rounding order
    # from torch.mean's pairwise reduction; matches to ~1e-6 rel typically.
    n_f = jnp.float32(n)
    mae = jnp.sum(abs_p) / n_f
    mse = jnp.sum(sq_p) / n_f
    cnt_gt = jnp.sum(gt_p).astype(jnp.float32)
    # mean(where(pred > targ, mae, mse))
    return (cnt_gt * mae + (n_f - cnt_gt) * mse) / n_f


def _reference(predictions, targets):
    d = predictions.astype(jnp.float32) - targets.astype(jnp.float32)
    mae = jnp.mean(jnp.abs(d))
    mse = jnp.mean(d * d)
    loss = jnp.where(predictions > targets, mae, mse)
    return jnp.mean(loss)


if __name__ == "__main__":
    key = jax.random.PRNGKey(0)
    k1, k2, k3, k4, k5, k6 = jax.random.split(key, 6)

    # Main example: NCHW prediction/target pair, like the PyTorch module.
    pred = jax.random.normal(k1, (2, 4, 16, 16), dtype=jnp.float32)
    targ = jax.random.normal(k2, (2, 4, 16, 16), dtype=jnp.float32)
    out = jax.block_until_ready(jax.jit(asymmetric_mae_mse_loss)(pred, targ))
    ref = _reference(pred, targ)
    assert jnp.allclose(out, ref, rtol=1e-5, atol=1e-5), (out, ref)

    # Unaligned element count (exercises the zero-pad path).
    pred = jax.random.normal(k3, (3, 7, 11, 13), dtype=jnp.float32)
    targ = jax.random.normal(k4, (3, 7, 11, 13), dtype=jnp.float32)
    out = jax.block_until_ready(jax.jit(asymmetric_mae_mse_loss)(pred, targ))
    ref = _reference(pred, targ)
    assert jnp.allclose(out, ref, rtol=1e-5, atol=1e-5), (out, ref)

    # Multi-block slab in bf16 (exercises the masked tail block + dtype cast).
    pred = jax.random.normal(k5, (2, 4, 160, 160), dtype=jnp.bfloat16)
    targ = jax.random.normal(k6, (2, 4, 160, 160), dtype=jnp.bfloat16)
    out = jax.block_until_ready(jax.jit(asymmetric_mae_mse_loss)(pred, targ))
    ref = _reference(pred, targ)
    assert jnp.allclose(out, ref, rtol=1e-4, atol=1e-4), (out, ref)

    print("KERNEL_OK")
</pallas_src>

<mosaic_0001>
module attributes {stable_mosaic.version = 11 : i64} {
  func.func @kernel(%arg0: i32, %arg1: i32, %arg2: memref<16x128xf32, #tpu.memory_space<vmem>>, %arg3: memref<16x128xf32, #tpu.memory_space<vmem>>, %arg4: memref<1x8x128xf32, #tpu.memory_space<vmem>>, %arg5: memref<1x8x128xf32, #tpu.memory_space<vmem>>, %arg6: memref<1x8x128xi32, #tpu.memory_space<vmem>>) attributes {dimension_semantics = [#tpu.dimension_semantics<parallel>, #tpu.dimension_semantics<arbitrary>], iteration_bounds = array<i64: 1, 1>, scalar_prefetch = 0 : i64, scratch_operands = 0 : i64, tpu.core_type = #tpu.core_type<tc>, window_params = [{transform_indices = @transform_0, window_bounds = array<i64: 16, 128>}, {transform_indices = @transform_1, window_bounds = array<i64: 16, 128>}, {transform_indices = @transform_2, window_bounds = array<i64: 1, 8, 128>}, {transform_indices = @transform_3, window_bounds = array<i64: 1, 8, 128>}, {transform_indices = @transform_4, window_bounds = array<i64: 1, 8, 128>}]} {
    %c0_i32 = arith.constant 0 : i32
    %0 = arith.cmpi eq, %arg1, %c0_i32 : i32
    %1 = arith.extui %0 : i1 to i32
    %c0_i32_0 = arith.constant 0 : i32
    %2 = arith.cmpi ne, %1, %c0_i32_0 : i32
    scf.if %2 {
      %cst_25 = arith.constant 0.000000e+00 : f32
      %34 = vector.broadcast %cst_25 : f32 to vector<1x8x128xf32>
      %c0_26 = arith.constant 0 : index
      %c0_27 = arith.constant 0 : index
      %c0_28 = arith.constant 0 : index
      %35 = vector.load %arg4[%c0_26, %c0_27, %c0_28] : memref<1x8x128xf32, #tpu.memory_space<vmem>>, vector<1x8x128xf32>
      tpu.vector_store %arg4[%c0_26, %c0_27, %c0_28], %34 {strides = array<i32>} : memref<1x8x128xf32, #tpu.memory_space<vmem>>, vector<1x8x128xf32>,
      %cst_29 = arith.constant 0.000000e+00 : f32
      %36 = vector.broadcast %cst_29 : f32 to vector<1x8x128xf32>
      %c0_30 = arith.constant 0 : index
      %c0_31 = arith.constant 0 : index
      %c0_32 = arith.constant 0 : index
      %37 = vector.load %arg5[%c0_30, %c0_31, %c0_32] : memref<1x8x128xf32, #tpu.memory_space<vmem>>, vector<1x8x128xf32>
      tpu.vector_store %arg5[%c0_30, %c0_31, %c0_32], %36 {strides = array<i32>} : memref<1x8x128xf32, #tpu.memory_space<vmem>>, vector<1x8x128xf32>,
      %c0_i32_33 = arith.constant 0 : i32
      %38 = vector.broadcast %c0_i32_33 : i32 to vector<1x8x128xi32>
      %c0_34 = arith.constant 0 : index
      %c0_35 = arith.constant 0 : index
      %c0_36 = arith.constant 0 : index
      %39 = vector.load %arg6[%c0_34, %c0_35, %c0_36] : memref<1x8x128xi32, #tpu.memory_space<vmem>>, vector<1x8x128xi32>
      tpu.vector_store %arg6[%c0_34, %c0_35, %c0_36], %38 {strides = array<i32>} : memref<1x8x128xi32, #tpu.memory_space<vmem>>, vector<1x8x128xi32>,
    } else {
    }
    %c0_i32_1 = arith.constant 0 : i32
    %c1_i32 = arith.constant 1 : i32
    %3 = arith.muli %c0_i32_1, %c1_i32 : i32
    %c0_i32_2 = arith.constant 0 : i32
    %4 = arith.addi %c0_i32_2, %3 : i32
    %c16_i32 = arith.constant 16 : i32
    %5 = arith.muli %4, %c16_i32 : i32
    %6 = tpu.assume_multiple %5, 16 : i32
    %7 = arith.index_cast %6 : i32 to index
    %c0 = arith.constant 0 : index
    %8 = vector.load %arg2[%7, %c0] : memref<16x128xf32, #tpu.memory_space<vmem>>, vector<16x128xf32>
    %9 = arith.index_cast %6 : i32 to index
    %c0_3 = arith.constant 0 : index
    %10 = vector.load %arg3[%9, %c0_3] : memref<16x128xf32, #tpu.memory_space<vmem>>, vector<16x128xf32>
    %11 = arith.subf %8, %10 : vector<16x128xf32>
    %c0_4 = arith.constant 0 : index
    %c0_5 = arith.constant 0 : index
    %c0_6 = arith.constant 0 : index
    %12 = vector.load %arg4[%c0_4, %c0_5, %c0_6] : memref<1x8x128xf32, #tpu.memory_space<vmem>>, vector<1x8x128xf32>
    %13 = math.absf %11 : vector<16x128xf32>
    %14 = vector.shape_cast %13 : vector<16x128xf32> to vector<2x8x128xf32>
    %cst = arith.constant dense<0.000000e+00> : vector<8x128xf32>
    %15 = vector.multi_reduction <add>, %14, %cst [0] : vector<2x8x128xf32> to vector<8x128xf32>
    %16 = vector.shape_cast %15 : vector<8x128xf32> to vector<1x8x128xf32>
    %17 = arith.addf %12, %16 : vector<1x8x128xf32>
    %c0_7 = arith.constant 0 : index
    %c0_8 = arith.constant 0 : index
    %c0_9 = arith.constant 0 : index
    %18 = vector.load %arg4[%c0_7, %c0_8, %c0_9] : memref<1x8x128xf32, #tpu.memory_space<vmem>>, vector<1x8x128xf32>
    tpu.vector_store %arg4[%c0_7, %c0_8, %c0_9], %17 {strides = array<i32>} : memref<1x8x128xf32, #tpu.memory_space<vmem>>, vector<1x8x128xf32>,
    %c0_10 = arith.constant 0 : index
    %c0_11 = arith.constant 0 : index
    %c0_12 = arith.constant 0 : index
    %19 = vector.load %arg5[%c0_10, %c0_11, %c0_12] : memref<1x8x128xf32, #tpu.memory_space<vmem>>, vector<1x8x128xf32>
    %20 = arith.mulf %11, %11 : vector<16x128xf32>
    %21 = vector.shape_cast %20 : vector<16x128xf32> to vector<2x8x128xf32>
    %cst_13 = arith.constant dense<0.000000e+00> : vector<8x128xf32>
    %22 = vector.multi_reduction <add>, %21, %cst_13 [0] : vector<2x8x128xf32> to vector<8x128xf32>
    %23 = vector.shape_cast %22 : vector<8x128xf32> to vector<1x8x128xf32>
    %24 = arith.addf %19, %23 : vector<1x8x128xf32>
    %c0_14 = arith.constant 0 : index
    %c0_15 = arith.constant 0 : index
    %c0_16 = arith.constant 0 : index
    %25 = vector.load %arg5[%c0_14, %c0_15, %c0_16] : memref<1x8x128xf32, #tpu.memory_space<vmem>>, vector<1x8x128xf32>
    tpu.vector_store %arg5[%c0_14, %c0_15, %c0_16], %24 {strides = array<i32>} : memref<1x8x128xf32, #tpu.memory_space<vmem>>, vector<1x8x128xf32>,
    %c0_17 = arith.constant 0 : index
    %c0_18 = arith.constant 0 : index
    %c0_19 = arith.constant 0 : index
    %26 = vector.load %arg6[%c0_17, %c0_18, %c0_19] : memref<1x8x128xi32, #tpu.memory_space<vmem>>, vector<1x8x128xi32>
    %27 = arith.cmpf ogt, %8, %10 : vector<16x128xf32>
    %28 = arith.extui %27 : vector<16x128xi1> to vector<16x128xi32>
    %29 = vector.shape_cast %28 : vector<16x128xi32> to vector<2x8x128xi32>
    %cst_20 = arith.constant dense<0> : vector<8x128xi32>
    %30 = vector.multi_reduction <add>, %29, %cst_20 [0] : vector<2x8x128xi32> to vector<8x128xi32>
    %31 = vector.shape_cast %30 : vector<8x128xi32> to vector<1x8x128xi32>
    %32 = arith.addi %26, %31 : vector<1x8x128xi32>
    %c0_21 = arith.constant 0 : index
    %c0_22 = arith.constant 0 : index
    %c0_23 = arith.constant 0 : index
    %33 = vector.load %arg6[%c0_21, %c0_22, %c0_23] : memref<1x8x128xi32, #tpu.memory_space<vmem>>, vector<1x8x128xi32>
    tpu.vector_store %arg6[%c0_21, %c0_22, %c0_23], %32 {strides = array<i32>} : memref<1x8x128xi32, #tpu.memory_space<vmem>>, vector<1x8x128xi32>,
    %c1_i32_24 = arith.constant 1 : i32
    return
  }
  func.func @transform_0(%arg0: i32, %arg1: i32) -> (i32, i32) {
    %c1_i32 = arith.constant 1 : i32
    %0 = arith.muli %arg0, %c1_i32 : i32
    %1 = arith.addi %0, %arg1 : i32
    %c0_i32 = arith.constant 0 : i32
    %2 = arith.minsi %1, %c0_i32 : i32
    %c0_i32_0 = arith.constant 0 : i32
    %c0_i32_1 = arith.constant 0 : i32
    return %2, %c0_i32_0 : i32, i32
  }
  func.func @transform_1(%arg0: i32, %arg1: i32) -> (i32, i32) {
    %c1_i32 = arith.constant 1 : i32
    %0 = arith.muli %arg0, %c1_i32 : i32
    %1 = arith.addi %0, %arg1 : i32
    %c0_i32 = arith.constant 0 : i32
    %2 = arith.minsi %1, %c0_i32 : i32
    %c0_i32_0 = arith.constant 0 : i32
    %c0_i32_1 = arith.constant 0 : i32
    return %2, %c0_i32_0 : i32, i32
  }
  func.func @transform_2(%arg0: i32, %arg1: i32) -> (i32, i32, i32) {
    %c0_i32 = arith.constant 0 : i32
    %c0_i32_0 = arith.constant 0 : i32
    %c0_i32_1 = arith.constant 0 : i32
    return %arg0, %c0_i32, %c0_i32_0 : i32, i32, i32
  }
  func.func @transform_3(%arg0: i32, %arg1: i32) -> (i32, i32, i32) {
    %c0_i32 = arith.constant 0 : i32
    %c0_i32_0 = arith.constant 0 : i32
    %c0_i32_1 = arith.constant 0 : i32
    return %arg0, %c0_i32, %c0_i32_0 : i32, i32, i32
  }
  func.func @transform_4(%arg0: i32, %arg1: i32) -> (i32, i32, i32) {
    %c0_i32 = arith.constant 0 : i32
    %c0_i32_0 = arith.constant 0 : i32
    %c0_i32_1 = arith.constant 0 : i32
    return %arg0, %c0_i32, %c0_i32_0 : i32, i32, i32
  }
}

</mosaic_0001>

<bundles_post_ra>
// kernel: asymmetric_mae_mse_loss.1
= control target key start
LH: loop header
LB: loop body
LE: loop exit
PB: predicated region body
PF: predicated region fallthrough
CT: control target
= control target key end

     0   :  { %v137_v6 = vmov 0   ;;  %s184_s0 = inlined_call_operand.vmem [shape: f32[16,128], index: 0, kind: input, shape index: {}]   ;;  %s185_s1 = inlined_call_operand.vmem [shape: f32[16,128], index: 1, kind: input, shape index: {}]   ;;  %s186_s4 = inlined_call_operand.vmem [shape: s32[1,8,128], index: 4, kind: output, shape index: {2}]   ;;  %s187_s2 = inlined_call_operand.vmem [shape: f32[1,8,128], index: 2, kind: output, shape index: {0}]   ;;  %s188_s3 = inlined_call_operand.vmem [shape: f32[1,8,128], index: 3, kind: output, shape index: {1}]  }
   0x1   :  { %v85_v0 = vld [vmem:[%s184_s0] sm:$0xff]  ;;  %v86_v1 = vld [vmem:[%s184_s0 + $0x8] sm:$0xff] }
   0x2   :  { %v87_v2 = vld [vmem:[%s185_s1] sm:$0xff]  ;;  %v88_v3 = vld [vmem:[%s185_s1 + $0x8] sm:$0xff] }
   0x3   :  { %v89_v4 = vsub.f32 %v85_v0, %v87_v2  ;;  %vm104_vm0 = vcmp.gt.f32.partialorder %v85_v0, %v87_v2  ;;  %v90_v5 = vsub.f32 %v86_v1, %v88_v3  ;;  %vm105_vm1 = vcmp.gt.f32.partialorder %v86_v1, %v88_v3 }
   0x4   :  { %v106_v7 = vsel %vm104_vm0, 1, %v137_v6  ;;  %v107_v8 = vsel %vm105_vm1, 1, %v137_v6 }
   0x5   :  { %v92_v9 = vand.u32 2147483647, %v89_v4  ;;  %v98_v10 = vmul.f32 %v89_v4, %v89_v4  ;;  %v108_v11 = vadd.s32 %v107_v8, %v106_v7  ;;  %v93_v12 = vand.u32 2147483647, %v90_v5 }
   0x6   :  { %v99_v13 = vmul.f32 %v90_v5, %v90_v5 }
   0x7   :  { %v94_v14 = vadd.f32 %v93_v12, %v92_v9  ;;  %110 = vst [vmem:[%s186_s4] sm:$0xff] %v108_v11 }
   0x8   :  { %v100_v15 = vadd.f32 %v99_v13, %v98_v10 }
   0x9   :  { %96 = vst [vmem:[%s187_s2] sm:$0xff] %v94_v14 }
   0xa   :  { %102 = vst [vmem:[%s188_s3] sm:$0xff] %v100_v15 }

</bundles_post_ra>
